<compile_context>
chip_gen: v7x
topology: tpu7x:2x2x1
jax: 0.10.0
libtpu: 0.0.40
codegen_flags: <defaults>
</compile_context>

<pallas_src>
import jax
import jax.numpy as jnp
from jax.experimental import pallas as pl
from jax.experimental.pallas import tpu as pltpu


def mlp_kernel(x_ref,
               w1_ref, b1_ref,
               w2_ref, b2_ref,
               w3_ref, b3_ref,
               w4_ref, b4_ref,
               o_ref):
    # x_ref: (6, T) slab, batch on the lane axis.  astype is a no-op when x is
    # already f32; it matters only when the wrapper ships x as bf16 over HBM.
    h = x_ref[...].astype(jnp.float32)

    # y = W @ h + b per layer (weights are (out, in), biases (out, 1)).
    h = jnp.tanh(jnp.dot(w1_ref[...], h, preferred_element_type=jnp.float32)
                 + b1_ref[...])
    h = jnp.tanh(jnp.dot(w2_ref[...], h, preferred_element_type=jnp.float32)
                 + b2_ref[...])
    h = jnp.tanh(jnp.dot(w3_ref[...], h, preferred_element_type=jnp.float32)
                 + b3_ref[...])
    h = jnp.tanh(jnp.dot(w4_ref[...], h, preferred_element_type=jnp.float32)
                 + b4_ref[...])

    o_ref[...] = h.astype(o_ref.dtype)   # (1, T): lane-dense, unmasked stores


def _resident_spec(shape):
    """Same block index every grid step -> fetched once, stays in VMEM."""
    return pl.BlockSpec(shape, lambda i, nd=len(shape): (0,) * nd)


def mlp_forward(x, params, *, tile_rows=8192, ship_bf16=False):
    """x: (N, 6) float32.  params: w1..w4 in (out,in) layout, b1..b4 as (out,1).

    Returns (N, 1) float32, matching the PyTorch module's forward.
    """
    n, fin = x.shape
    assert fin == 6

    # Batch tile: multiple of 128 (lane width), capped to the (rounded) batch.
    tile = max(128, ((min(tile_rows, n) + 127) // 128) * 128)
    n_pad = pl.cdiv(n, tile) * tile

    # Layout plumbing on the host: pad the batch, put it on the lane axis.
    x_t = jnp.pad(x, ((0, n_pad - n), (0, 0))).T          # (6, n_pad)
    if ship_bf16:
        x_t = x_t.astype(jnp.bfloat16)                    # halve HBM read bytes

    w1, b1 = params["w1"], params["b1"]
    w2, b2 = params["w2"], params["b2"]
    w3, b3 = params["w3"], params["b3"]
    w4, b4 = params["w4"], params["b4"]

    out_t = pl.pallas_call(
        mlp_kernel,
        out_shape=jax.ShapeDtypeStruct((1, n_pad), jnp.float32),
        grid=(n_pad // tile,),
        in_specs=[
            # streamed, auto double-buffered input tile
            pl.BlockSpec((6, tile), lambda i: (0, i)),
            # resident weights / biases
            _resident_spec(w1.shape), _resident_spec(b1.shape),
            _resident_spec(w2.shape), _resident_spec(b2.shape),
            _resident_spec(w3.shape), _resident_spec(b3.shape),
            _resident_spec(w4.shape), _resident_spec(b4.shape),
        ],
        out_specs=pl.BlockSpec((1, tile), lambda i: (0, i)),
        compiler_params=pltpu.CompilerParams(
            dimension_semantics=("parallel",)),   # shard batch tiles across TCs (v7x)
    )(x_t, w1, b1, w2, b2, w3, b3, w4, b4)

    return out_t[0, :n][:, None]                           # back to (N, 1)


def init_params():
    """Deterministic init mimicking PyTorch nn.Linear defaults.

    Weights in PyTorch layout (out_features, in_features); biases as (out, 1)
    columns so they broadcast along the lane (batch) axis inside the kernel.
    """
    key = jax.random.PRNGKey(0)
    dims = [(6, 32), (32, 8), (8, 4), (4, 1)]
    params = {}
    for i, (fan_in, fan_out) in enumerate(dims, start=1):
        key, kw, kb = jax.random.split(key, 3)
        bound = 1.0 / (fan_in ** 0.5)
        params[f"w{i}"] = jax.random.uniform(
            kw, (fan_out, fan_in), minval=-bound, maxval=bound, dtype=jnp.float32)
        params[f"b{i}"] = jax.random.uniform(
            kb, (fan_out, 1), minval=-bound, maxval=bound, dtype=jnp.float32)
    return params


if __name__ == "__main__":
    params = init_params()

    key = jax.random.PRNGKey(0)
    x = jax.random.normal(key, (8, 6), dtype=jnp.float32)   # batch=8, in_features=6

    out = mlp_forward(x, params)
    out = jax.block_until_ready(out)

    # Reference in plain JAX (same math as the PyTorch forward).
    ref = x
    for i in range(1, 5):
        ref = jnp.tanh(ref @ params[f"w{i}"].T + params[f"b{i}"].T)

    assert out.shape == (8, 1)
    assert jnp.allclose(out, ref, atol=1e-5, rtol=1e-5)

    # Also exercise the bf16-over-HBM path (v6e/v7x bandwidth optimization);
    # looser tolerance due to bf16 input quantization through stacked tanh.
    out_bf16 = jax.block_until_ready(mlp_forward(x, params, ship_bf16=True))
    assert jnp.allclose(out_bf16, ref, atol=5e-2, rtol=5e-2)

    print("KERNEL_OK")
</pallas_src>

<mosaic_0001>
module attributes {stable_mosaic.version = 11 : i64} {
  func.func @mlp_kernel(%arg0: i32, %arg1: memref<6x128xf32, #tpu.memory_space<vmem>>, %arg2: memref<32x6xf32, #tpu.memory_space<vmem>>, %arg3: memref<32x1xf32, #tpu.memory_space<vmem>>, %arg4: memref<8x32xf32, #tpu.memory_space<vmem>>, %arg5: memref<8x1xf32, #tpu.memory_space<vmem>>, %arg6: memref<4x8xf32, #tpu.memory_space<vmem>>, %arg7: memref<4x1xf32, #tpu.memory_space<vmem>>, %arg8: memref<1x4xf32, #tpu.memory_space<vmem>>, %arg9: memref<1x1xf32, #tpu.memory_space<vmem>>, %arg10: memref<1x128xf32, #tpu.memory_space<vmem>>) attributes {dimension_semantics = [#tpu.dimension_semantics<parallel>], iteration_bounds = array<i64: 1>, scalar_prefetch = 0 : i64, scratch_operands = 0 : i64, tpu.core_type = #tpu.core_type<tc>, window_params = [{transform_indices = @transform_0, window_bounds = array<i64: 6, 128>}, {pipeline_mode = #tpu.pipeline_mode<synchronous>, transform_indices = @transform_1, window_bounds = array<i64: 32, 6>}, {pipeline_mode = #tpu.pipeline_mode<synchronous>, transform_indices = @transform_2, window_bounds = array<i64: 32, 1>}, {pipeline_mode = #tpu.pipeline_mode<synchronous>, transform_indices = @transform_3, window_bounds = array<i64: 8, 32>}, {pipeline_mode = #tpu.pipeline_mode<synchronous>, transform_indices = @transform_4, window_bounds = array<i64: 8, 1>}, {pipeline_mode = #tpu.pipeline_mode<synchronous>, transform_indices = @transform_5, window_bounds = array<i64: 4, 8>}, {pipeline_mode = #tpu.pipeline_mode<synchronous>, transform_indices = @transform_6, window_bounds = array<i64: 4, 1>}, {pipeline_mode = #tpu.pipeline_mode<synchronous>, transform_indices = @transform_7, window_bounds = array<i64: 1, 4>}, {pipeline_mode = #tpu.pipeline_mode<synchronous>, transform_indices = @transform_8, window_bounds = array<i64: 1, 1>}, {transform_indices = @transform_9, window_bounds = array<i64: 1, 128>}]} {
    %c0 = arith.constant 0 : index
    %c0_0 = arith.constant 0 : index
    %0 = vector.load %arg1[%c0, %c0_0] : memref<6x128xf32, #tpu.memory_space<vmem>>, vector<6x128xf32>
    %c0_1 = arith.constant 0 : index
    %c0_2 = arith.constant 0 : index
    %1 = vector.load %arg2[%c0_1, %c0_2] : memref<32x6xf32, #tpu.memory_space<vmem>>, vector<32x6xf32>
    %cst = arith.constant dense<0.000000e+00> : vector<32x128xf32>
    %2 = tpu.matmul %1, %0, %cst {dimension_numbers = #tpu.dot_dimension_numbers<[1], [0], [0], [1], [0, 0, 1, 1], [], []>} : vector<32x6xf32>, vector<6x128xf32>, vector<32x128xf32> -> vector<32x128xf32>
    %c0_3 = arith.constant 0 : index
    %c0_4 = arith.constant 0 : index
    %3 = vector.load %arg3[%c0_3, %c0_4] : memref<32x1xf32, #tpu.memory_space<vmem>>, vector<32x1xf32>
    %4 = vector.broadcast %3 : vector<32x1xf32> to vector<32x128xf32>
    %5 = arith.addf %2, %4 : vector<32x128xf32>
    %6 = math.tanh %5 : vector<32x128xf32>
    %c0_5 = arith.constant 0 : index
    %c0_6 = arith.constant 0 : index
    %7 = vector.load %arg4[%c0_5, %c0_6] : memref<8x32xf32, #tpu.memory_space<vmem>>, vector<8x32xf32>
    %cst_7 = arith.constant dense<0.000000e+00> : vector<8x128xf32>
    %8 = tpu.matmul %7, %6, %cst_7 {dimension_numbers = #tpu.dot_dimension_numbers<[1], [0], [0], [1], [0, 0, 1, 1], [], []>} : vector<8x32xf32>, vector<32x128xf32>, vector<8x128xf32> -> vector<8x128xf32>
    %c0_8 = arith.constant 0 : index
    %c0_9 = arith.constant 0 : index
    %9 = vector.load %arg5[%c0_8, %c0_9] : memref<8x1xf32, #tpu.memory_space<vmem>>, vector<8x1xf32>
    %10 = vector.broadcast %9 : vector<8x1xf32> to vector<8x128xf32>
    %11 = arith.addf %8, %10 : vector<8x128xf32>
    %12 = math.tanh %11 : vector<8x128xf32>
    %c0_10 = arith.constant 0 : index
    %c0_11 = arith.constant 0 : index
    %13 = vector.load %arg6[%c0_10, %c0_11] : memref<4x8xf32, #tpu.memory_space<vmem>>, vector<4x8xf32>
    %cst_12 = arith.constant dense<0.000000e+00> : vector<4x128xf32>
    %14 = tpu.matmul %13, %12, %cst_12 {dimension_numbers = #tpu.dot_dimension_numbers<[1], [0], [0], [1], [0, 0, 1, 1], [], []>} : vector<4x8xf32>, vector<8x128xf32>, vector<4x128xf32> -> vector<4x128xf32>
    %c0_13 = arith.constant 0 : index
    %c0_14 = arith.constant 0 : index
    %15 = vector.load %arg7[%c0_13, %c0_14] : memref<4x1xf32, #tpu.memory_space<vmem>>, vector<4x1xf32>
    %16 = vector.broadcast %15 : vector<4x1xf32> to vector<4x128xf32>
    %17 = arith.addf %14, %16 : vector<4x128xf32>
    %18 = math.tanh %17 : vector<4x128xf32>
    %c0_15 = arith.constant 0 : index
    %c0_16 = arith.constant 0 : index
    %19 = vector.load %arg8[%c0_15, %c0_16] : memref<1x4xf32, #tpu.memory_space<vmem>>, vector<1x4xf32>
    %cst_17 = arith.constant dense<0.000000e+00> : vector<1x128xf32>
    %20 = tpu.matmul %19, %18, %cst_17 {dimension_numbers = #tpu.dot_dimension_numbers<[1], [0], [0], [1], [0, 0, 1, 1], [], []>} : vector<1x4xf32>, vector<4x128xf32>, vector<1x128xf32> -> vector<1x128xf32>
    %c0_18 = arith.constant 0 : index
    %c0_19 = arith.constant 0 : index
    %21 = vector.load %arg9[%c0_18, %c0_19] : memref<1x1xf32, #tpu.memory_space<vmem>>, vector<1x1xf32>
    %22 = vector.broadcast %21 : vector<1x1xf32> to vector<1x128xf32>
    %23 = arith.addf %20, %22 : vector<1x128xf32>
    %24 = math.tanh %23 : vector<1x128xf32>
    %c0_20 = arith.constant 0 : index
    %c0_21 = arith.constant 0 : index
    %25 = vector.load %arg10[%c0_20, %c0_21] : memref<1x128xf32, #tpu.memory_space<vmem>>, vector<1x128xf32>
    tpu.vector_store %arg10[%c0_20, %c0_21], %24 {strides = array<i32>} : memref<1x128xf32, #tpu.memory_space<vmem>>, vector<1x128xf32>,
    return
  }
  func.func @transform_0(%arg0: i32) -> (i32, i32) {
    %c0_i32 = arith.constant 0 : i32
    %c0_i32_0 = arith.constant 0 : i32
    return %c0_i32, %arg0 : i32, i32
  }
  func.func @transform_1(%arg0: i32) -> (i32, i32) {
    %c0_i32 = arith.constant 0 : i32
    %c0_i32_0 = arith.constant 0 : i32
    %c0_i32_1 = arith.constant 0 : i32
    return %c0_i32, %c0_i32_0 : i32, i32
  }
  func.func @transform_2(%arg0: i32) -> (i32, i32) {
    %c0_i32 = arith.constant 0 : i32
    %c0_i32_0 = arith.constant 0 : i32
    %c0_i32_1 = arith.constant 0 : i32
    return %c0_i32, %c0_i32_0 : i32, i32
  }
  func.func @transform_3(%arg0: i32) -> (i32, i32) {
    %c0_i32 = arith.constant 0 : i32
    %c0_i32_0 = arith.constant 0 : i32
    %c0_i32_1 = arith.constant 0 : i32
    return %c0_i32, %c0_i32_0 : i32, i32
  }
  func.func @transform_4(%arg0: i32) -> (i32, i32) {
    %c0_i32 = arith.constant 0 : i32
    %c0_i32_0 = arith.constant 0 : i32
    %c0_i32_1 = arith.constant 0 : i32
    return %c0_i32, %c0_i32_0 : i32, i32
  }
  func.func @transform_5(%arg0: i32) -> (i32, i32) {
    %c0_i32 = arith.constant 0 : i32
    %c0_i32_0 = arith.constant 0 : i32
    %c0_i32_1 = arith.constant 0 : i32
    return %c0_i32, %c0_i32_0 : i32, i32
  }
  func.func @transform_6(%arg0: i32) -> (i32, i32) {
    %c0_i32 = arith.constant 0 : i32
    %c0_i32_0 = arith.constant 0 : i32
    %c0_i32_1 = arith.constant 0 : i32
    return %c0_i32, %c0_i32_0 : i32, i32
  }
  func.func @transform_7(%arg0: i32) -> (i32, i32) {
    %c0_i32 = arith.constant 0 : i32
    %c0_i32_0 = arith.constant 0 : i32
    %c0_i32_1 = arith.constant 0 : i32
    return %c0_i32, %c0_i32_0 : i32, i32
  }
  func.func @transform_8(%arg0: i32) -> (i32, i32) {
    %c0_i32 = arith.constant 0 : i32
    %c0_i32_0 = arith.constant 0 : i32
    %c0_i32_1 = arith.constant 0 : i32
    return %c0_i32, %c0_i32_0 : i32, i32
  }
  func.func @transform_9(%arg0: i32) -> (i32, i32) {
    %c0_i32 = arith.constant 0 : i32
    %c0_i32_0 = arith.constant 0 : i32
    return %c0_i32, %arg0 : i32, i32
  }
}

</mosaic_0001>

<bundles_post_ra>
// kernel: tpu_custom_call.1
= control target key start
LH: loop header
LB: loop body
LE: loop exit
PB: predicated region body
PF: predicated region fallthrough
CT: control target
= control target key end

     0   :  { %s661_s0 = inlined_call_operand.vmem [shape: f32[6,128], index: 0, kind: input, shape index: {}]   ;;  %s662_s1 = inlined_call_operand.vmem [shape: f32[32,6], index: 1, kind: input, shape index: {}]   ;;  %s663_s2 = inlined_call_operand.vmem [shape: f32[32,1], index: 2, kind: input, shape index: {}]   ;;  %s664_s3 = inlined_call_operand.vmem [shape: f32[8,32], index: 3, kind: input, shape index: {}]   ;;  %s665_s4 = inlined_call_operand.vmem [shape: f32[8,1], index: 4, kind: input, shape index: {}]   ;;  %s666_s5 = inlined_call_operand.vmem [shape: f32[4,8], index: 5, kind: input, shape index: {}]   ;;  %s667_s6 = inlined_call_operand.vmem [shape: f32[4,1], index: 6, kind: input, shape index: {}]   ;;  %s668_s7 = inlined_call_operand.vmem [shape: f32[1,4], index: 7, kind: input, shape index: {}]   ;;  %s669_s8 = inlined_call_operand.<no memory space> [shape: f32[1,1], index: 8, kind: input, shape index: {}]   ;;  %s670_s9 = inlined_call_operand.hbm [shape: f32[1,128], index: 9, kind: output, shape index: {}]  }
   0x1   :  { %v14_v0 = vstv %s669_s8 }
   0x2   :  { %15 = vst [vmem:[#allocation2] sm:$0x1] %v14_v0 }
   0x3   :  { %v35_v1 = vld [vmem:[%s661_s0] sm:$0x3f]  ;;  %vm77_vm0 = vcmask 1045504   ;;  %vm64_vm1 = vcmask 48128   ;;  %v37_v3 = vld [vmem:[%s662_s1 + $0x8] sm:$0xff]  ;;  %v38_v4 = vld [vmem:[%s662_s1 + $0x10] sm:$0xff] }
   0x4   :  { %v36_v2 = vld [vmem:[%s662_s1] sm:$0xff]  ;;  %462 = vmatprep.subr.msk.mxu0 %vm77_vm0, %v35_v1  ;;  %v542_v6 = vmov 0   ;;  %v42_v7 = vld [vmem:[%s663_s2 + $0x10] sm:$0xff]  ;;  %v39_v8 = vld [vmem:[%s662_s1 + $0x18] sm:$0xff] }
   0x5   :  { %464 = vmatprep.mubr.msk.f32.mxu0 %vm64_vm1, %v36_v2  ;;  %v40_v5 = vld [vmem:[%s663_s2] sm:$0xff]  ;;  %463 = vmatpush3.msk.msra.mxu0 %vm77_vm0, %v35_v1  ;;  %v41_v9 = vld [vmem:[%s663_s2 + $0x8] sm:$0xff] }
   0x6   :  { %502 = vset.pattern.permute.xlu0 %v542_v6  ;;  %465 = vmatmul.mubr.msk.f32.vlgmr.msra.gmra.mrb[0].mxu0 %vm64_vm1, %v37_v3 }
   0x7   :  { %46 = vperm.xlu0 %502, %v40_v5   ;;  %467 = vmatprep.mubr.msk.f32.mxu0 %vm64_vm1, %v38_v4 }
   0x8   :  { %503 = vset.pattern.permute.xlu1 %v542_v6 }
   0x9   :  { %16 = vsyncpa [#allocation4], 0  ;;  %56 = vperm.xlu1 %503, %v42_v7   ;;  %v43_v10 = vld [vmem:[%s663_s2 + $0x18] sm:$0xff]  ;;  %v171_v11 = vld [vmem:[%s665_s4] sm:$0xff]  ;;  %v543_v14 = vmov 0.0|0.0   ;;  %vm544_vm2 = vmmov 0   ;;  %v341_v47 = vlaneseq }
   0xa   :  { %468 = vmatmul.mubr.msk.f32.gmra.mrb[2].mxu0 %vm64_vm1, %v39_v8  ;;  %v253_v12 = vld [vmem:[%s667_s6] sm:$0xf]  ;;  %491 = vmatprep.subr.bf16.mxu1 %v543_v14  ;;  %v545_v15 = vmov 0.0   ;;  %vm177_vm3 = vcmask 261120   ;;  %vm259_vm4 = vcmask 64512   ;;  %vm349_vm5 = vcmask 1043456  }
   0xb   :  { %51 = vperm.xlu0 %502, %v41_v9   ;;  %v335_v13 = vld [vmem:[#allocation2] sm:$0x1]  ;;  %478 = vmatprep.mubr.msk.f32.mxu1 %vm544_vm2, %v545_v15  ;;  %vm345_vm6 = vcmask 31744   ;;  %v342_v48 = vshrl.u32 %v341_v47, 7 }
   0xc   :  { %481 = vmatprep.subr.mxu0 %v545_v15  ;;  %483 = vmatprep.mubr.msk.f32.mxu0 %vm544_vm2, %v545_v15  ;;  %v170_v34 = vld [vmem:[%s664_s3] sm:$0xff] }
   0xd   :  { %61 = vperm.xlu1 %503, %v43_v10   ;;  %v252_v39 = vld [vmem:[%s666_s5] sm:$0xf]  ;;  %v343_v49 = vsub.s32 0, %v342_v48  ;;  %s546_s5 = smov [#allocation3]  }
   0xe   :  { %v334_v45 = vld [vmem:[%s668_s7] sm:$0x1]  ;;  %s431_s11 = sshll.u32 %s546_s5, 4  ;;  %s432_s11 = int_to_ptr.vmem [resolvable:$true] %s431_s11 }
   0xf   :  { %174 = vperm.xlu0 %502, %v171_v11   ;;  %s518_s12 = scalar_lea.vmem %s432_s11, 16  ;;  %s522_s7 = scalar_lea.vmem %s432_s11, 32 }
  0x10   :  { %p519_p0 = scmp.ne.s32.totalorder %s432_s11, %s518_s12  ;;  %p523_p1 = scmp.lt.s32.totalorder %s432_s11, %s432_s11 }
  0x11   :  { %256 = vperm.xlu1 %503, %v253_v12   ;;  %p524_p2 = scmp.lt.s32.totalorder %s522_s7, %s518_s12 }
  0x13   :  { %338 = vperm.xlu0 %502, %v335_v13   ;;  %p525_p3 = por %p524_p2, %p523_p1 }
  0x15   :  { %p526_p4 = pnand %p525_p3, %p519_p0 }
  0x86   :  { %v47_v16 = vpop.permute.xlu0 %46 }
  0x88   :  { %v57_v17 = vpop.permute.xlu1 %56 }
  0x8a   :  { %v52_v18 = vpop.permute.xlu0 %51 }
  0x8c   :  { %v62_v23 = vpop.permute.xlu1 %61 }
  0x8e   :  { %v175_v35 = vpop.permute.xlu0 %174 }
  0x90   :  { %v257_v41 = vpop.permute.xlu1 %256 }
  0x92   :  { %v339_v50 = vpop.permute.xlu0 %338 }
  0x93   :  { %v344_v51 = vrot.slane %v339_v50, %v343_v49 }
  0xd9   :  { %v466_v19 = vpop.f32.mrb[0].mxu0 }
  0xda   :  { %v153_v20 = vadd.f32 %v466_v19, %v52_v18  ;;  %v147_v21 = vpop.f32.mrb[1].mxu0 }
  0xdb   :  { %v148_v22 = vadd.f32 %v147_v21, %v47_v16 }
  0xdc   :  { %504 = vtanh.f32 %v153_v20 }
  0xdd   :  { %506 = vtanh.f32 %v148_v22  ;;  %v469_v24 = vpop.f32.mrb[2].mxu0 }
  0xde   :  { %v163_v25 = vadd.f32 %v469_v24, %v62_v23  ;;  %v157_v26 = vpop.f32.mrb[3].mxu0 }
  0xdf   :  { %v158_v27 = vadd.f32 %v157_v26, %v57_v17 }
  0xe0   :  { %508 = vtanh.f32 %v163_v25 }
  0xe1   :  { %510 = vtanh.f32 %v158_v27 }
  0xe6   :  { %v505_v28 = vpop.eup %504 }
  0xe7   :  { %v507_v29 = vpop.eup %506 }
  0xe8   :  { %v492_v30 = vpack.c.bf16 %v505_v28, %v507_v29 }
  0xea   :  { %v509_v31 = vpop.eup %508  ;;  %493 = vmatpush3.bf16.msra.mxu1 %v492_v30 }
  0xeb   :  { %v511_v32 = vpop.eup %510  ;;  %494 = vmatprep.subr.bf16.mxu1 %v543_v14 }
  0xec   :  { %v495_v33 = vpack.c.bf16 %v509_v31, %v511_v32 }
  0xee   :  { %496 = vmatpush3.bf16.msra.mxu1 %v495_v33 }
  0xef   :  { %486 = vmatprep.subr.mxu1 %v545_v15 }
  0xf1   :  { %479 = vmatmul.mubr.msk.f32.vlgmr.msra.gmra.mrb[0].mxu1 %vm177_vm3, %v170_v34 }
  0xf2   :  { %488 = vmatprep.mubr.msk.f32.mxu1 %vm544_vm2, %v545_v15 }
 0x1c4   :  { %v247_v36 = vpop.f32.mrb[0].mxu1 }
 0x1c5   :  { %v248_v37 = vadd.f32 %v247_v36, %v175_v35  ;;  %v480_v38 = vpop.f32.mrb[1].mxu1 }
 0x1c7   :  { %512 = vtanh.f32 %v248_v37 }
 0x1d1   :  { %v513_v40 = vpop.eup %512 }
 0x1d2   :  { %482 = vmatpush3.msra.mxu0 %v513_v40 }
 0x1d3   :  { %484 = vmatmul.mubr.msk.f32.vlgmr.msra.gmra.mrb[4].mxu0 %vm259_vm4, %v252_v39 }
 0x2a6   :  { %v329_v42 = vpop.f32.mrb[4].mxu0 }
 0x2a7   :  { %v330_v43 = vadd.f32 %v329_v42, %v257_v41  ;;  %v485_v44 = vpop.f32.mrb[5].mxu0 }
 0x2a9   :  { %514 = vtanh.f32 %v330_v43 }
 0x2b3   :  { %v515_v46 = vpop.eup %514 }
 0x2b4   :  { %487 = vmatpush3.msk.msra.mxu1 %vm349_vm5, %v515_v46 }
 0x2b5   :  { %489 = vmatmul.mubr.msk.f32.vlgmr.msra.gmra.mrb[2].mxu1 %vm345_vm6, %v334_v45 }
 0x388   :  { %v419_v52 = vpop.f32.mrb[2].mxu1 }
 0x389   :  { %v420_v53 = vadd.f32 %v419_v52, %v344_v51  ;;  %v490_v54 = vpop.f32.mrb[3].mxu1 }
 0x38b   :  { %516 = vtanh.f32 %v420_v53 }
 0x395   :  { %v517_v55 = vpop.eup %516 }
 0x396   :  { %424 = vst [vmem:[#allocation3] sm:$0x1] %v517_v55 }
 0x397   :  { %529 = shalt.err (!%p526_p4)
}
 0x398   :  { %s530_s15 = scalar_lea.hbm %s670_s9, 16 }
 0x399   :  { %p531_p5 = scmp.ne.s32.totalorder %s670_s9, %s530_s15  ;;  %p534_p6 = scmp.lt.u32.totalorder %s530_s15, %s670_s9 }
 0x39b   :  { %p536_p7 = pnand %p534_p6, %p531_p5 }
 0x39d   :  { %539 = shalt.err (!%p536_p7)
}
 0x39e   :  { %434 = dma.vmem_to_hbm [thread:$0]  %s432_s11, 16, %s670_s9, [#allocation4]  }
 0x39f   :  { %540 = dma.done.wait [#allocation4], 16  }
 0x3a0   :  { %541 = vsyncadd [#allocation4], 4294967280 }
 0x3a1   :  { %438 = vsyncpa [#allocation4], 1 }

</bundles_post_ra>
